<compile_context>
chip_gen: v7x
topology: tpu7x:2x2x1
jax: 0.10.0
libtpu: 0.0.40
codegen_flags: <defaults>
</compile_context>

<pallas_src>
import jax
import jax.numpy as jnp
from jax.experimental import pallas as pl
from jax.experimental.pallas import tpu as pltpu

NUM_CHANNELS = 3  # RGB, fixed by rgb_mean / rgb_std buffers


def metric3d_kernel(params_ref, img_ref, depth_ref):
    """One grid step = one (batch, H-tile) block.

    params_ref : SMEM f32[4]           (s0, s1, s2, offset) -- folded scale/offset
    img_ref    : VMEM f32[3, TH, Wp]   (batch dim squeezed)
    depth_ref  : VMEM f32[TH, Wp]      (batch & channel dims squeezed)
    """
    s0 = params_ref[0]
    s1 = params_ref[1]
    s2 = params_ref[2]
    off = params_ref[3]

    # Fused normalize_image + synthetic linear depth head:
    #   (x - mean)/std * w  + b   ==   x * (w/std) + (b - sum(mean*w/std))
    # TODO(synk): real meta_arch.inference (Metric3D ViT/ConvNeXt backbone +
    # decoder) is an external injected module; replaced by a linear depth head.
    depth_ref[...] = (img_ref[0] * s0 + img_ref[1] * s1 + img_ref[2] * s2) + off


def metric3d_forward(image, rgb_mean, rgb_std, head_w, head_b, *, tile_h=8):
    """image: f32[N, 3, H, W]  ->  pred_depth: f32[N, 1, H, W]"""
    N, C, H, W = image.shape
    assert C == NUM_CHANNELS

    # Fold normalization + head into per-channel scale and a single offset.
    scale = (head_w / rgb_std).astype(jnp.float32)                   # f32[3]
    offset = (head_b[0] - jnp.sum(rgb_mean * scale)).astype(jnp.float32)
    params = jnp.concatenate([scale, offset[None]])                  # f32[4]

    # Pad W to a lane-dense multiple of 128 and H to a multiple of tile_h
    # (tile_h itself a multiple of 8 so the sublane tiling is clean).
    Wp = pl.cdiv(W, 128) * 128
    Hp = pl.cdiv(H, tile_h) * tile_h
    if Hp != H or Wp != W:
        image = jnp.pad(image, ((0, 0), (0, 0), (0, Hp - H), (0, Wp - W)))

    grid = (N, Hp // tile_h)

    out = pl.pallas_call(
        metric3d_kernel,
        out_shape=jax.ShapeDtypeStruct((N, 1, Hp, Wp), jnp.float32),
        grid_spec=pltpu.PrefetchScalarGridSpec(
            num_scalar_prefetch=0,
            grid=grid,
            in_specs=[
                # Folded scalars: single tiny SMEM array.
                pl.BlockSpec(memory_space=pltpu.MemorySpace.SMEM),
                # Image: one (C, TH, Wp) block per grid step, batch squeezed.
                pl.BlockSpec(
                    (pl.Squeezed(), C, tile_h, Wp),
                    lambda n, h: (n, 0, h, 0),
                ),
            ],
            out_specs=pl.BlockSpec(
                (pl.Squeezed(), pl.Squeezed(), tile_h, Wp),
                lambda n, h: (n, 0, h, 0),
            ),
        ),
        compiler_params=pltpu.CompilerParams(
            dimension_semantics=("parallel", "parallel"),
        ),
    )(params, image)

    # Crop the lane/H padding back off.
    return out[:, :, :H, :W]


def metric3d_reference(image, rgb_mean, rgb_std, head_w, head_b):
    """Pure-JAX reference mirroring the PyTorch semantics."""
    m = rgb_mean.reshape(1, NUM_CHANNELS, 1, 1)
    s = rgb_std.reshape(1, NUM_CHANNELS, 1, 1)
    norm = (image - m) / s
    w = head_w.reshape(1, NUM_CHANNELS, 1, 1)
    depth = jnp.sum(norm * w, axis=1, keepdims=True) + head_b[0]
    return depth


if __name__ == "__main__":
    key = jax.random.PRNGKey(0)

    # Small shapes consistent with the module's NCHW RGB input
    # (real input_size is (616, 1064); we use 16x16 for the smoke test).
    N, C, H, W = 2, 3, 16, 16
    image = jax.random.uniform(key, (N, C, H, W), jnp.float32, 0.0, 255.0)

    # Buffers from __init__ (exact values from the PyTorch module).
    rgb_mean = jnp.array([123.675, 116.28, 103.53], dtype=jnp.float32)
    rgb_std = jnp.array([58.395, 57.12, 57.375], dtype=jnp.float32)

    # Deterministic synthetic "meta_arch" depth-head parameters.
    head_w = jnp.array([0.25, 0.5, 0.25], dtype=jnp.float32)
    head_b = jnp.array([1.0], dtype=jnp.float32)

    pred_depth = metric3d_forward(image, rgb_mean, rgb_std, head_w, head_b)
    pred_depth = jax.block_until_ready(pred_depth)

    ref = metric3d_reference(image, rgb_mean, rgb_std, head_w, head_b)
    assert pred_depth.shape == (N, 1, H, W)
    assert jnp.allclose(pred_depth, ref, atol=1e-4, rtol=1e-5), (
        "Pallas output mismatch vs. pure-JAX reference"
    )

    print("KERNEL_OK")
</pallas_src>

<mosaic_0001>
module attributes {stable_mosaic.version = 11 : i64} {
  func.func @metric3d_kernel(%arg0: i32, %arg1: i32, %arg2: memref<4xf32, #tpu.memory_space<smem>>, %arg3: memref<1x3x8x128xf32, #tpu.memory_space<vmem>>, %arg4: memref<1x1x8x128xf32, #tpu.memory_space<vmem>>) attributes {dimension_semantics = [#tpu.dimension_semantics<parallel>, #tpu.dimension_semantics<parallel>], iteration_bounds = array<i64: 2, 2>, scalar_prefetch = 0 : i64, scratch_operands = 0 : i64, tpu.core_type = #tpu.core_type<tc>, window_params = [{transform_indices = @transform_0, window_bounds = array<i64: 4>}, {transform_indices = @transform_1, window_bounds = array<i64: 1, 3, 8, 128>}, {transform_indices = @transform_2, window_bounds = array<i64: 1, 1, 8, 128>}]} {
    %c0 = arith.constant 0 : index
    %0 = memref.load %arg2[%c0] : memref<4xf32, #tpu.memory_space<smem>>
    %c1 = arith.constant 1 : index
    %1 = memref.load %arg2[%c1] : memref<4xf32, #tpu.memory_space<smem>>
    %c2 = arith.constant 2 : index
    %2 = memref.load %arg2[%c2] : memref<4xf32, #tpu.memory_space<smem>>
    %c3 = arith.constant 3 : index
    %3 = memref.load %arg2[%c3] : memref<4xf32, #tpu.memory_space<smem>>
    %c0_0 = arith.constant 0 : index
    %c0_1 = arith.constant 0 : index
    %c0_2 = arith.constant 0 : index
    %c0_3 = arith.constant 0 : index
    %4 = vector.load %arg3[%c0_0, %c0_1, %c0_2, %c0_3] : memref<1x3x8x128xf32, #tpu.memory_space<vmem>>, vector<1x1x8x128xf32>
    %5 = vector.shape_cast %4 : vector<1x1x8x128xf32> to vector<8x128xf32>
    %6 = vector.broadcast %0 : f32 to vector<8x128xf32>
    %7 = arith.mulf %5, %6 : vector<8x128xf32>
    %c0_4 = arith.constant 0 : index
    %c1_5 = arith.constant 1 : index
    %c0_6 = arith.constant 0 : index
    %c0_7 = arith.constant 0 : index
    %8 = vector.load %arg3[%c0_4, %c1_5, %c0_6, %c0_7] : memref<1x3x8x128xf32, #tpu.memory_space<vmem>>, vector<1x1x8x128xf32>
    %9 = vector.shape_cast %8 : vector<1x1x8x128xf32> to vector<8x128xf32>
    %10 = vector.broadcast %1 : f32 to vector<8x128xf32>
    %11 = arith.mulf %9, %10 : vector<8x128xf32>
    %12 = arith.addf %7, %11 : vector<8x128xf32>
    %c0_8 = arith.constant 0 : index
    %c2_9 = arith.constant 2 : index
    %c0_10 = arith.constant 0 : index
    %c0_11 = arith.constant 0 : index
    %13 = vector.load %arg3[%c0_8, %c2_9, %c0_10, %c0_11] : memref<1x3x8x128xf32, #tpu.memory_space<vmem>>, vector<1x1x8x128xf32>
    %14 = vector.shape_cast %13 : vector<1x1x8x128xf32> to vector<8x128xf32>
    %15 = vector.broadcast %2 : f32 to vector<8x128xf32>
    %16 = arith.mulf %14, %15 : vector<8x128xf32>
    %17 = arith.addf %12, %16 : vector<8x128xf32>
    %18 = vector.broadcast %3 : f32 to vector<8x128xf32>
    %19 = arith.addf %17, %18 : vector<8x128xf32>
    %c0_12 = arith.constant 0 : index
    %c0_13 = arith.constant 0 : index
    %c0_14 = arith.constant 0 : index
    %c0_15 = arith.constant 0 : index
    %20 = vector.load %arg4[%c0_12, %c0_13, %c0_14, %c0_15] : memref<1x1x8x128xf32, #tpu.memory_space<vmem>>, vector<1x1x8x128xf32>
    %21 = vector.shape_cast %20 : vector<1x1x8x128xf32> to vector<8x128xf32>
    %22 = vector.shape_cast %19 : vector<8x128xf32> to vector<1x1x8x128xf32>
    tpu.vector_store %arg4[%c0_12, %c0_13, %c0_14, %c0_15], %22 {strides = array<i32>} : memref<1x1x8x128xf32, #tpu.memory_space<vmem>>, vector<1x1x8x128xf32>,
    return
  }
  func.func @transform_0(%arg0: i32, %arg1: i32) -> i32 {
    %c0_i32 = arith.constant 0 : i32
    %c0_i32_0 = arith.constant 0 : i32
    return %c0_i32 : i32
  }
  func.func @transform_1(%arg0: i32, %arg1: i32) -> (i32, i32, i32, i32) {
    %c0_i32 = arith.constant 0 : i32
    %c0_i32_0 = arith.constant 0 : i32
    %c0_i32_1 = arith.constant 0 : i32
    return %arg0, %c0_i32, %arg1, %c0_i32_0 : i32, i32, i32, i32
  }
  func.func @transform_2(%arg0: i32, %arg1: i32) -> (i32, i32, i32, i32) {
    %c0_i32 = arith.constant 0 : i32
    %c0_i32_0 = arith.constant 0 : i32
    %c0_i32_1 = arith.constant 0 : i32
    return %arg0, %c0_i32, %arg1, %c0_i32_0 : i32, i32, i32, i32
  }
}

</mosaic_0001>

<bundles_post_ra>
// kernel: tpu_custom_call.1
= control target key start
LH: loop header
LB: loop body
LE: loop exit
PB: predicated region body
PF: predicated region fallthrough
CT: control target
= control target key end

     0   :  { %s828_s0 = inlined_call_operand.hbm [shape: f32[4], index: 0, kind: input, shape index: {}]   ;;  %s829_s1 = inlined_call_operand.hbm [shape: f32[2,3,16,128], index: 1, kind: input, shape index: {}]   ;;  %s830_s2 = inlined_call_operand.hbm [shape: f32[2,1,16,128], index: 2, kind: output, shape index: {}]  }
   0x1   :  { %837 = sst [smem:[#allocation13_spill]] %s828_s0 }
   0x2   :  { %7 = vsyncpa [#allocation5], 0 }
   0x3   :  { %8 = vsyncpa [#allocation3], 0 }
   0x4   :  { %10 = vsyncpa [#allocation3 + $0x1], 0 }
   0x5   :  { %11 = vsyncpa [#allocation4], 0 }
   0x6   :  { %13 = vsyncpa [#allocation4 + $0x1], 0  ;;  %s606_s9 = smov 0   ;;  %s608_s10 = smov 0  }
   0x7   :  { %s610_s11 = smov 0   ;;  %s612_s12 = smov 0  }
   0x8   :  { %s614_s13 = smov 0   ;;  %s616_s14 = smov 0  }
   0x9   :  { %s618_s15 = smov 0   ;;  %s620_s16 = smov 0  }
   0xa LB: > { %s324_s17 = sadd.s32 4294967295, %s583_s16   ;;  %s325_s18 = sadd.s32 4294967294, %s583_s16   ;;  %s583_s16 = sphi %s620_s16, %s19_s16   ;;  %s579_s15 = sphi %s618_s15, %s861_s15   ;;  %s575_s14 = sphi %s616_s14, %s860_s14   ;;  %s571_s13 = sphi %s614_s13, %s859_s13   ;;  %s567_s12 = sphi %s612_s12, %s858_s12   ;;  %s563_s11 = sphi %s610_s11, %s857_s11   ;;  %s559_s10 = sphi %s608_s10, %s856_s10   ;;  %s555_s9 = sphi %s606_s9, %s855_s9  }
   0xb   : > { %p68_p0 = scmp.ne.s32.totalorder %s563_s11, %s559_s10  ;;  %p69_p1 = scmp.eq.s32.totalorder %s583_s16, 0 }
   0xc   : > { %p74_p2 = scmp.ne.s32.totalorder %s559_s10, %s555_s9  ;;  %p654_p3 = scmp.eq.s32.totalorder %s324_s17, 0 }
   0xd   : > { %p100_p4 = scmp.eq.s32.totalorder %s324_s17, 3  ;;  %p70_p5 = por %p69_p1, %p68_p0 }
   0xe   : > { %s838_s20 = scalar_select %p654_p3, 1, 0 }
   0xf   : > { %p106_p6 = scmp.eq.s32.totalorder %s325_s18, 3  ;;  %p660_p7 = por %p654_p3, %p74_p2 }
  0x10   : > { %p664_p8 = por %p100_p4, %p68_p0  ;;  %p326_p10 = scmp.ge.s32.totalorder %s583_s16, 1 }
  0x11   : > { %s839_s21 = scalar_select %p660_p7, 1, 0 }
  0x12   : > { %s840_s22 = scalar_select %p664_p8, 1, 0 }
  0x13   : > { %p668_p9 = por %p106_p6, %p74_p2  ;;  %p113_p11 = scmp.lt.s32.totalorder %s583_s16, 5 }
  0x14   : > { %p367_p13 = scmp.lt.s32.totalorder %s583_s16, 4  ;;  %p845_p0 = scmp.ne.s32.totalorder %s838_s20, 0 }
  0x15   : > { %s841_s23 = scalar_select %p668_p9, 1, 0 }
  0x16   : > { %p674_p12 = pnand %p326_p10, %p113_p11  ;;  %p681_p3 = pnand %p367_p13, %p70_p5 }
  0x17   : > { %842 = sst [smem:[#allocation11_spill]] %s841_s23  ;;  %s28_s26 = sadd.s32 1, %s575_s14 }
  0x18   : > { %p354_p1 = pneg %p674_p12  ;;  %s31_s27 = sadd.s32 1, %s579_s15 }
  0x19   : > { %p29_p2 = scmp.ge.s32.totalorder %s28_s26, 2  ;;  %s846_s0 = sld [smem:[#allocation13_spill]] }
  0x1a   : > { %p355_p4 = pnand %p354_p1, %p845_p0 }
  0x1c   : > { %p440_p10 = pneg %p355_p4 }
  0x1f   : > { %s438_s30 = scalar_lea.hbm %s846_s0, 16 }
  0x20   : > { %p439_p6 = scmp.ne.s32.totalorder %s846_s0, %s438_s30  ;;  %p445_p5 = scmp.lt.u32.totalorder %s438_s30, %s846_s0 }
  0x22   : > { %p441_p11 = pnand %p440_p10, %p439_p6 }
  0x24   : > { %p442_p9 = pneg %p441_p11 }
  0x26   : > { %p447_p13 = pnand %p445_p5, %p442_p9 }
  0x28   : > { %450 = shalt.err (!%p447_p13)
}
  0x29   : > { %s585_s7 = smov [#allocation2]   ;;  %s863_s26 = smov (%p29_p2, %s28_s26), 0 }
  0x2a   : > { %357 = dma.hbm_to_smem (!%p355_p4), %s846_s0, 16, %s585_s7, [#allocation5]  }
  0x2b   : > { %847 = sst [smem:[#allocation12_spill]] %s863_s26  ;;  %s865_s27 = smov (!%p29_p2, %s31_s27), %s579_s15 }
  0x2c   : > { %s57_s18 = ssub.s32 %s575_s14, %s863_s26  ;;  %s135_s28 = sand.u32 1, %s563_s11  }
  0x2d   : > { %p33_p9 = scmp.ge.s32.totalorder %s865_s27, 2  ;;  %s343_s29 = smul.u32 24, %s135_s28 }
  0x2e   : > { %s344_s30 = smul.u32 6, %s579_s15  ;;  %s848_s26 = sadd.s32 1, %s563_s11 }
  0x2f   : > { %s867_s27 = smov (%p33_p9, %s865_s27), 0  ;;  %s139_s4 = scalar_lea.vmem [#allocation6], %s343_s29 }
  0x30   : > { %s56_s3 = ssub.s32 %s579_s15, %s867_s27  ;;  %s147_s5 = sshll.u32 %s139_s4, 4  ;;  %s718_s5 = int_to_ptr.vmem [resolvable:$true] %s147_s5 }
  0x31   : > { %s58_s6 = sor.u32 %s57_s18, %s56_s3  ;;  %s144_s7 = sadd.s32 %s575_s14, %s344_s30 }
  0x32   : > { %p59_p1 = scmp.eq.s32.totalorder %s58_s6, 0  ;;  %s329_s8 = sshll.u32 %s144_s7, 7 }
  0x33   : > { %s716_s0 = scalar_lea.hbm %s829_s1, %s329_s8  ;;  %s725_s29 = scalar_lea.sflag [#allocation3], %s135_s28 }
  0x34   : > { %s723_s23 = scalar_select %p59_p1, %s563_s11, %s848_s26  }
  0x35   : > { %s451_s18 = scalar_lea.hbm %s716_s0, 384  ;;  %p453_p4 = pneg %p681_p3 }
  0x36   : > { %p452_p0 = scmp.ne.s32.totalorder %s716_s0, %s451_s18  ;;  %s456_s3 = scalar_lea.hbm %s829_s1, 1536 }
  0x37   : > { %p457_p10 = scmp.lt.u32.totalorder %s716_s0, %s829_s1  ;;  %p458_p11 = scmp.lt.u32.totalorder %s456_s3, %s451_s18 }
  0x38   : > { %p454_p2 = pnand %p453_p4, %p452_p0  ;;  %p460_p13 = scmp.lt.u32.totalorder %s451_s18, %s716_s0 }
  0x39   : > { %p459_p5 = por %p458_p11, %p457_p10 }
  0x3a   : > { %p455_p6 = pneg %p454_p2 }
  0x3b   : > { %p461_p9 = por %p460_p13, %p459_p5 }
  0x3d   : > { %p462_p1 = pnand %p461_p9, %p455_p6 }
  0x3f   : > { %465 = shalt.err (!%p462_p1)
}
  0x40   : > { %s466_s26 = scalar_lea.vmem %s718_s5, 384  ;;  %s586_s28 = smov [#allocation6]  }
  0x41   : > { %p467_p0 = scmp.ne.s32.totalorder %s718_s5, %s466_s26  ;;  %s471_s7 = sshll.u32 %s586_s28, 4  ;;  %s472_s7 = int_to_ptr.vmem [resolvable:$false] %s471_s7 }
  0x42   : > { %s473_s8 = scalar_lea.vmem %s472_s7, 768  ;;  %p474_p7 = scmp.lt.s32.totalorder %s718_s5, %s472_s7 }
  0x43   : > { %p469_p2 = pnand %p467_p0, %p453_p4  ;;  %p475_p10 = scmp.lt.s32.totalorder %s473_s8, %s466_s26 }
  0x45   : > { %p470_p8 = pneg %p469_p2  ;;  %p476_p11 = por %p475_p10, %p474_p7 }
  0x47   : > { %p477_p5 = pnand %p476_p11, %p470_p8 }
  0x49   : > { %480 = shalt.err (!%p477_p5)
}
  0x4a   : > { %s587_s17 = smov 256   ;;  %s588_s18 = smov 128  }
  0x4b   : > { %s589_s19 = smov 8   ;;  %159 = sbr.rel (%p674_p12) target bundleno = 119 (0x77), region = 28 }
  0x4c   : > { %361 = dma.hbm_to_vmem [thread:$0]  (!%p681_p3), %s716_s0, 384, %s718_s5, %s725_s29, %s587_s17, %s588_s18, %s589_s19  }
  0x4d   : > { %p849_p4 = scmp.ne.s32.totalorder (!%p674_p12), %s838_s20, 0 }
  0x52   : > { %542 = dma.done.wait (%p849_p4), [#allocation5], 16  }
  0x53   : > { %544 = vsyncadd (%p849_p4), [#allocation5], 4294967280  ;;  %s760_s30 = sand.u32 1, %s559_s10   ;;  %p850_p7 = scmp.ne.s32.totalorder %s839_s21, 0 }
  0x54   : > { %s345_s3 = smul.u32 24, %s760_s30  ;;  %s166_s4 = scalar_lea.sflag [#allocation3], %s760_s30 }
  0x56   : > { %s169_s6 = scalar_lea.vmem [#allocation6], %s345_s3 }
  0x57   : > { %546 = dma.done.wait (%p850_p7), %s166_s4, 384  }
  0x58   : > { %548 = vsyncadd (%p850_p7), %s166_s4, 4294966912 }
  0x59   : > { %174 = sfence }
  0x5a   : > { %s191_s0 = sld [smem:[#allocation2]]  ;;  %s333_s20 = sld [smem:[#allocation2 + $0x1]]  ;;  %v195_v0 = vld [vmem:[%s169_s6] sm:$0xff]  ;;  %v336_v1 = vld [vmem:[%s169_s6 + $0x8] sm:$0xff]  ;;  %v337_v3 = vld [vmem:[%s169_s6 + $0x10] sm:$0xff] }
  0x5b   : > { %s334_s24 = sld [smem:[#allocation2 + $0x2]]  ;;  %s335_s25 = sld [smem:[#allocation2 + $0x3]] }
  0x5c   : > { %s332_s5 = sshll.u32 %s760_s30, 3  ;;  %s339_s29 = sshll.u32 %s571_s13, 1 }
  0x5d   : > { %s223_s21 = sadd.s32 %s567_s12, %s339_s29  ;;  %s190_s26 = scalar_lea.vmem [#allocation7], %s332_s5 }
  0x5e   : > { %s227_s28 = sshll.u32 %s190_s26, 4  ;;  %s340_s7 = sshll.u32 %s223_s21, 7  ;;  %s771_s28 = int_to_ptr.vmem [resolvable:$true] %s227_s28 }
  0x5f   : > { %s776_s17 = scalar_lea.hbm %s830_s2, %s340_s7  ;;  %s212_s12 = scalar_lea.sflag [#allocation4], %s760_s30 }
  0x60   : > { %v196_v2 = vstv %s191_s0  ;;  %v200_v5 = vstv %s333_s20  ;;  %s481_s18 = scalar_lea.vmem %s771_s28, 128  ;;  %p851_p8 = scmp.ne.s32.totalorder %s840_s22, 0 }
  0x61   : > { %v197_v4 = vmul.f32 %v196_v2, %v195_v0  ;;  %v201_v6 = vmul.f32 %v336_v1, %v200_v5  ;;  %v205_v7 = vstv %s334_s24  ;;  %v208_v10 = vstv %s335_s25  ;;  %p482_p3 = scmp.ne.s32.totalorder %s771_s28, %s481_s18  ;;  %s590_s19 = smov [#allocation7]  }
  0x62   : > { %v206_v8 = vmul.f32 %v337_v3, %v205_v7  ;;  %s485_s3 = sshll.u32 %s590_s19, 4  ;;  %s486_s3 = int_to_ptr.vmem [resolvable:$false] %s485_s3 }
  0x63   : > { %v202_v9 = vadd.f32 %v201_v6, %v197_v4  ;;  %p483_p12 = pnand %p482_p3, %p851_p8  ;;  %s487_s4 = scalar_lea.vmem %s486_s3, 256 }
  0x64   : > { %p488_p13 = scmp.lt.s32.totalorder %s771_s28, %s486_s3  ;;  %p489_p9 = scmp.lt.s32.totalorder %s487_s4, %s481_s18 }
  0x65   : > { %v207_v11 = vadd.f32 %v206_v8, %v202_v9  ;;  %p484_p6 = pneg %p483_p12 }
  0x66   : > { %p490_p1 = por %p489_p9, %p488_p13 }
  0x67   : > { %v209_v12 = vadd.f32 %v208_v10, %v207_v11 }
  0x68   : > { %p491_p0 = pnand %p490_p1, %p484_p6 }
  0x69   : > { %210 = vst [vmem:[%s190_s26] sm:$0xff] %v209_v12 }
  0x6a   : > { %494 = shalt.err (!%p491_p0)
}
  0x6b   : > { %s495_s30 = scalar_lea.hbm %s776_s17, 128  ;;  %s499_s20 = scalar_lea.hbm %s830_s2, 512 }
  0x6c   : > { %p496_p2 = scmp.ne.s32.totalorder %s776_s17, %s495_s30  ;;  %p500_p5 = scmp.lt.u32.totalorder %s776_s17, %s830_s2 }
  0x6d   : > { %p501_p4 = scmp.lt.u32.totalorder %s499_s20, %s495_s30  ;;  %p503_p3 = scmp.lt.u32.totalorder %s495_s30, %s776_s17 }
  0x6e   : > { %p497_p10 = pnand %p496_p2, %p851_p8 }
  0x6f   : > { %p502_p7 = por %p501_p4, %p500_p5 }
  0x70   : > { %p498_p11 = pneg %p497_p10 }
  0x71   : > { %p504_p12 = por %p503_p3, %p502_p7 }
  0x73   : > { %p505_p6 = pnand %p504_p12, %p498_p11 }
  0x75   : > { %508 = shalt.err (!%p505_p6)
}
  0x76   : > { %352 = dma.vmem_to_hbm [thread:$0]  (%p851_p8), %s771_s28, 128, %s776_s17, %s212_s12  }
  0x77 PF: > { %s852_s5 = sld [smem:[#allocation11_spill]]  ;;  %p369_p13 = scmp.ge.s32.totalorder %s583_s16, 2 }
  0x78   : > { %s239_s29 = sand.u32 1, %s555_s9  }
  0x79   : > { %s240_s21 = scalar_lea.sflag [#allocation4], %s239_s29 }
  0x7d   : > { %p853_p9 = scmp.ne.s32.totalorder %s852_s5, 0 }
  0x7f   : > { %p363_p1 = pnand %p369_p13, %p853_p9 }
  0x81   : > { %550 = dma.done.wait (!%p363_p1), %s240_s21, 128  }
  0x82   : > { %552 = vsyncadd (!%p363_p1), %s240_s21, 4294967168  ;;  %s19_s16 = sadd.s32 1, %s583_s16   ;;  %s854_s22 = sld [smem:[#allocation12_spill]] }
  0x83   : > { %p16_p0 = scmp.ge.s32.totalorder %s19_s16, 6   ;;  %s855_s9 = smov %s559_s10 }
  0x84   : > { %s856_s10 = smov %s563_s11  ;;  %s857_s11 = smov %s723_s23 }
  0x85   : > { %s858_s12 = smov %s575_s14  ;;  %s859_s13 = smov %s579_s15 }
  0x86   : > { %s861_s15 = smov %s867_s27  ;;  %18 = sbr.rel (!%p16_p0) target bundleno = 10 (0xa), region = 80 }
  0x88   : > { %s860_s14 = smov %s854_s22 }
  0x8d   :  { %245 = vsyncpa [#allocation3], 1 }
  0x8e   :  { %247 = vsyncpa [#allocation3 + $0x1], 1 }
  0x8f   :  { %248 = vsyncpa [#allocation4], 1 }
  0x90   :  { %250 = vsyncpa [#allocation4 + $0x1], 1 }
  0x91   :  { %251 = vsyncpa [#allocation5], 1 }
  0x92   :  { %253 = vsyncpa [#allocation5 + $0x1], 1 }

</bundles_post_ra>
